<compile_context>
chip_gen: v7x
topology: tpu7x:2x2x1
jax: 0.10.0
libtpu: 0.0.40
codegen_flags: <defaults>
</compile_context>

<pallas_src>
import functools

import jax
import jax.numpy as jnp
from jax.experimental import pallas as pl
from jax.experimental.pallas import tpu as pltpu


# --------------------------------------------------------------------------
# Kernel 1: fused qkv projection (exact, native dtype, wide lane-dense store)
# --------------------------------------------------------------------------
def _qkv_proj_kernel(x_ref, wqkv_ref, qkv_ref):
    # x_ref: (1, Tn, C), wqkv_ref: (C, 3C), qkv_ref: (1, Tn, 3C)
    qkv = jnp.dot(x_ref[0], wqkv_ref[...], preferred_element_type=jnp.float32)
    qkv_ref[0] = qkv.astype(qkv_ref.dtype)


# --------------------------------------------------------------------------
# Kernel 2: attention core + output projection, tiled over query rows
# --------------------------------------------------------------------------
def _attn_core_kernel(q_ref, k_ref, v_ref, wproj_ref, bproj_ref, out_ref,
                      *, num_heads: int, scale: float, compute_dtype):
    # q_ref: (1, Tq, C)  k_ref/v_ref: (1, N, C)  wproj_ref: (C, C)
    # bproj_ref: (1, C)  out_ref: (1, Tq, C)
    Tq, C = q_ref.shape[1], q_ref.shape[2]
    head_dim = C // num_heads

    def to_heads(x2d):
        # (rows, C) -> (H, rows, Dh): ONE reshape + ONE transpose
        # (replaces H per-head lane slices + jnp.stack).
        rows = x2d.shape[0]
        return jnp.transpose(x2d.reshape(rows, num_heads, head_dim), (1, 0, 2))

    # Cast MXU operands to the compute dtype (bf16 by default) up front so the
    # relayouts below also run at the narrow width; scale folded into q.
    q = to_heads(q_ref[0].astype(compute_dtype) * scale)       # (H, Tq, Dh)
    k = to_heads(k_ref[0].astype(compute_dtype))               # (H, N,  Dh)
    v = to_heads(v_ref[0].astype(compute_dtype))               # (H, N,  Dh)

    # Head-batched attention scores, f32 accumulation: (H, Tq, N).
    s = jnp.einsum('hqd,hkd->hqk', q, k, preferred_element_type=jnp.float32)

    # Softmax statistics in f32.
    m = jnp.max(s, axis=-1, keepdims=True)
    p = jnp.exp(s - m)
    l = jnp.sum(p, axis=-1, keepdims=True)                     # (H, Tq, 1)

    # Unnormalized context, then one normalization on (H, Tq, Dh) using the
    # EUP approximate reciprocal (cheaper than scaling the (H,Tq,N) probs).
    ctx = jnp.einsum('hqk,hkd->hqd', p.astype(compute_dtype), v,
                     preferred_element_type=jnp.float32)
    ctx = ctx * pl.reciprocal(l, approx=True)                  # (H, Tq, Dh) f32

    # Single relayout back to (Tq, C), then one full-K (K=C) output projection.
    attn_out = jnp.transpose(ctx, (1, 0, 2)).reshape(Tq, C).astype(compute_dtype)
    y = jnp.dot(attn_out, wproj_ref[...], preferred_element_type=jnp.float32)
    y = y + bproj_ref[0].astype(jnp.float32)
    out_ref[0] = y.astype(out_ref.dtype)


# --------------------------------------------------------------------------
# Wrapper
# --------------------------------------------------------------------------
def _pick_tile(n: int, cap: int) -> int:
    """Largest tile <= cap that divides n and keeps (8,128) block legality."""
    if n <= cap:
        return n
    t = (cap // 8) * 8
    while t >= 8:
        if n % t == 0:
            return t
        t -= 8
    return n  # no legal divisor <= cap: use the full extent


def _vmem_limit_bytes() -> int:
    """~3/4 of per-core VMEM: ~96 MiB on v5e/v6e (128 MiB), ~48 MiB on v7x."""
    cap = None
    try:
        cap = getattr(pltpu.get_tpu_info(), "vmem_capacity_bytes", None)
    except Exception:
        cap = None
    if not cap:
        cap = 64 * 1024 * 1024
    return min(int(cap) * 3 // 4, 100 * 1024 * 1024)


def attention_ds(x, w_qkv_t, w_proj_t, b_proj, *, num_heads: int,
                 q_tile: int = 256, n_tile: int = 256,
                 mxu_dtype=jnp.bfloat16):
    """x: (B, N, C); w_qkv_t: (C, 3C); w_proj_t: (C, C); b_proj: (C,).

    Returns (out, (q_flat, k_flat, v_flat)) matching AttentionDS.forward.
    `mxu_dtype` is the attention-core MXU operand dtype (flat q/k/v outputs and
    all accumulations are unaffected); pass jnp.float32 for exact parity.
    """
    B, N, C = x.shape
    assert C % num_heads == 0
    head_dim = C // num_heads
    scale = float(head_dim) ** -0.5
    b_proj2d = b_proj.reshape(1, C)

    Tn = _pick_tile(N, n_tile)
    Tq = _pick_tile(N, q_tile)
    vmem_limit = _vmem_limit_bytes()

    # ---- pass 1: fused qkv projection -> flat lane-dense (B, N, 3C) --------
    qkv_flat = pl.pallas_call(
        _qkv_proj_kernel,
        out_shape=jax.ShapeDtypeStruct((B, N, 3 * C), x.dtype),
        grid_spec=pltpu.PrefetchScalarGridSpec(
            num_scalar_prefetch=0,
            grid=(B, N // Tn),
            in_specs=[
                pl.BlockSpec((1, Tn, C), lambda b, i: (b, i, 0)),    # x tile
                pl.BlockSpec((C, 3 * C), lambda b, i: (0, 0)),       # w_qkv_t
            ],
            out_specs=pl.BlockSpec((1, Tn, 3 * C), lambda b, i: (b, i, 0)),
        ),
        compiler_params=pltpu.CompilerParams(
            dimension_semantics=("parallel", "parallel"),
            vmem_limit_bytes=vmem_limit),
    )(x, w_qkv_t)

    # Flat q/k/v (module outputs) — also feed the attention core with clean
    # (last dim == C) BlockSpecs, avoiding sub-lane-width slicing in-kernel.
    q_flat = qkv_flat[:, :, 0 * C:1 * C]
    k_flat = qkv_flat[:, :, 1 * C:2 * C]
    v_flat = qkv_flat[:, :, 2 * C:3 * C]

    # ---- pass 2: attention core + output projection, query-tiled -----------
    kernel = functools.partial(_attn_core_kernel, num_heads=num_heads,
                               scale=scale, compute_dtype=mxu_dtype)
    w_proj_c = w_proj_t.astype(mxu_dtype)   # weight only used inside the core

    out = pl.pallas_call(
        kernel,
        out_shape=jax.ShapeDtypeStruct((B, N, C), x.dtype),
        grid_spec=pltpu.PrefetchScalarGridSpec(
            num_scalar_prefetch=0,
            grid=(B, N // Tq),
            in_specs=[
                pl.BlockSpec((1, Tq, C), lambda b, qi: (b, qi, 0)),  # q tile
                pl.BlockSpec((1, N, C), lambda b, qi: (b, 0, 0)),    # k (full)
                pl.BlockSpec((1, N, C), lambda b, qi: (b, 0, 0)),    # v (full)
                pl.BlockSpec((C, C), lambda b, qi: (0, 0)),          # w_proj
                pl.BlockSpec((1, C), lambda b, qi: (0, 0)),          # b_proj
            ],
            out_specs=pl.BlockSpec((1, Tq, C), lambda b, qi: (b, qi, 0)),
        ),
        compiler_params=pltpu.CompilerParams(
            dimension_semantics=("parallel", "parallel"),
            vmem_limit_bytes=vmem_limit),
    )(q_flat, k_flat, v_flat, w_proj_c, b_proj2d)

    return out, (q_flat, k_flat, v_flat)


# --------------------------------------------------------------------------
# Pure-JAX reference mirroring the PyTorch forward
# --------------------------------------------------------------------------
def attention_ds_reference(x, w_qkv_t, w_proj_t, b_proj, *, num_heads: int):
    B, N, C = x.shape
    head_dim = C // num_heads
    scale = float(head_dim) ** -0.5

    qkv_tmp = x @ w_qkv_t                                    # (B, N, 3C)
    qkv = qkv_tmp.reshape(B, N, 3, num_heads, head_dim).transpose(2, 0, 3, 1, 4)
    q, k, v = qkv[0], qkv[1], qkv[2]                         # (B, H, N, Dh)
    qkv_out = qkv_tmp.reshape(B, N, 3, C).transpose(2, 0, 1, 3)

    attn = (q @ jnp.swapaxes(k, -2, -1)) * scale
    attn = jax.nn.softmax(attn, axis=-1)
    out = (attn @ v).transpose(0, 2, 1, 3).reshape(B, N, C)
    out = out @ w_proj_t + b_proj
    return out, (qkv_out[0], qkv_out[1], qkv_out[2])


if __name__ == "__main__":
    # Small shapes consistent with the module: B=2, N=8 tokens, dim=32, 4 heads.
    B, N, C = 2, 8, 32
    num_heads = 4

    key = jax.random.PRNGKey(0)
    kx, kqkv, kproj, kb = jax.random.split(key, 4)

    x = jax.random.normal(kx, (B, N, C), dtype=jnp.float32)
    # qkv_bias=False -> no qkv bias; proj has bias.
    w_qkv_t = jax.random.normal(kqkv, (C, 3 * C), dtype=jnp.float32) * (C ** -0.5)
    w_proj_t = jax.random.normal(kproj, (C, C), dtype=jnp.float32) * (C ** -0.5)
    b_proj = jax.random.normal(kb, (C,), dtype=jnp.float32) * 0.02

    ref_out, (rq, rk, rv) = attention_ds_reference(x, w_qkv_t, w_proj_t, b_proj,
                                                   num_heads=num_heads)

    # Default path: bf16 MXU operands in the attention core, f32 accumulation.
    out, (q_f, k_f, v_f) = attention_ds(x, w_qkv_t, w_proj_t, b_proj,
                                        num_heads=num_heads)
    jax.block_until_ready(out)
    jax.block_until_ready(q_f)
    jax.block_until_ready(k_f)
    jax.block_until_ready(v_f)

    # Flat projections are exact f32 matmuls (stored before any cast).
    assert jnp.allclose(q_f, rq, atol=1e-4, rtol=1e-4)
    assert jnp.allclose(k_f, rk, atol=1e-4, rtol=1e-4)
    assert jnp.allclose(v_f, rv, atol=1e-4, rtol=1e-4)
    # bf16 attention-core run: typical relative error ~1%; loose bound 4e-2.
    rel_err = jnp.linalg.norm(out - ref_out) / jnp.linalg.norm(ref_out)
    assert float(rel_err) < 4e-2, f"bf16-core relative error too high: {rel_err}"

    # f32 attention-core path for tight numerical parity with the reference
    # (remaining tolerance absorbs the EUP approximate reciprocal).
    out_f32, _ = attention_ds(x, w_qkv_t, w_proj_t, b_proj,
                              num_heads=num_heads, mxu_dtype=jnp.float32)
    jax.block_until_ready(out_f32)
    assert jnp.allclose(out_f32, ref_out, atol=5e-3, rtol=5e-3)

    print("KERNEL_OK")
</pallas_src>

<mosaic_0001>
module attributes {stable_mosaic.version = 11 : i64} {
  func.func @_qkv_proj_kernel(%arg0: i32, %arg1: i32, %arg2: memref<1x8x32xf32, #tpu.memory_space<vmem>>, %arg3: memref<32x96xf32, #tpu.memory_space<vmem>>, %arg4: memref<1x8x96xf32, #tpu.memory_space<vmem>>) attributes {dimension_semantics = [#tpu.dimension_semantics<parallel>, #tpu.dimension_semantics<parallel>], iteration_bounds = array<i64: 2, 1>, scalar_prefetch = 0 : i64, scratch_operands = 0 : i64, tpu.core_type = #tpu.core_type<tc>, window_params = [{transform_indices = @transform_0, window_bounds = array<i64: 1, 8, 32>}, {pipeline_mode = #tpu.pipeline_mode<synchronous>, transform_indices = @transform_1, window_bounds = array<i64: 32, 96>}, {transform_indices = @transform_2, window_bounds = array<i64: 1, 8, 96>}]} {
    %c0 = arith.constant 0 : index
    %c0_0 = arith.constant 0 : index
    %c0_1 = arith.constant 0 : index
    %0 = vector.load %arg2[%c0, %c0_0, %c0_1] : memref<1x8x32xf32, #tpu.memory_space<vmem>>, vector<1x8x32xf32>
    %1 = vector.shape_cast %0 : vector<1x8x32xf32> to vector<8x32xf32>
    %c0_2 = arith.constant 0 : index
    %c0_3 = arith.constant 0 : index
    %2 = vector.load %arg3[%c0_2, %c0_3] : memref<32x96xf32, #tpu.memory_space<vmem>>, vector<32x96xf32>
    %cst = arith.constant dense<0.000000e+00> : vector<8x96xf32>
    %3 = tpu.matmul %1, %2, %cst {dimension_numbers = #tpu.dot_dimension_numbers<[1], [0], [0], [1], [0, 0, 1, 1], [], []>} : vector<8x32xf32>, vector<32x96xf32>, vector<8x96xf32> -> vector<8x96xf32>
    %c0_4 = arith.constant 0 : index
    %c0_5 = arith.constant 0 : index
    %c0_6 = arith.constant 0 : index
    %4 = vector.load %arg4[%c0_4, %c0_5, %c0_6] : memref<1x8x96xf32, #tpu.memory_space<vmem>>, vector<1x8x96xf32>
    %5 = vector.shape_cast %4 : vector<1x8x96xf32> to vector<8x96xf32>
    %6 = vector.shape_cast %3 : vector<8x96xf32> to vector<1x8x96xf32>
    tpu.vector_store %arg4[%c0_4, %c0_5, %c0_6], %6 {strides = array<i32>} : memref<1x8x96xf32, #tpu.memory_space<vmem>>, vector<1x8x96xf32>,
    return
  }
  func.func @transform_0(%arg0: i32, %arg1: i32) -> (i32, i32, i32) {
    %c0_i32 = arith.constant 0 : i32
    %c0_i32_0 = arith.constant 0 : i32
    return %arg0, %arg1, %c0_i32 : i32, i32, i32
  }
  func.func @transform_1(%arg0: i32, %arg1: i32) -> (i32, i32) {
    %c0_i32 = arith.constant 0 : i32
    %c0_i32_0 = arith.constant 0 : i32
    %c0_i32_1 = arith.constant 0 : i32
    return %c0_i32, %c0_i32_0 : i32, i32
  }
  func.func @transform_2(%arg0: i32, %arg1: i32) -> (i32, i32, i32) {
    %c0_i32 = arith.constant 0 : i32
    %c0_i32_0 = arith.constant 0 : i32
    return %arg0, %arg1, %c0_i32 : i32, i32, i32
  }
}

</mosaic_0001>

<bundles_post_ra>
// kernel: tpu_custom_call.1
= control target key start
LH: loop header
LB: loop body
LE: loop exit
PB: predicated region body
PF: predicated region fallthrough
CT: control target
= control target key end

     0   :  { %7 = vsyncpa [#allocation3], 0  ;;  %s876_s0 = inlined_call_operand.hbm [shape: f32[2,8,32], index: 0, kind: input, shape index: {}]   ;;  %s877_s1 = inlined_call_operand.hbm [shape: f32[32,96], index: 1, kind: input, shape index: {}]   ;;  %s878_s2 = inlined_call_operand.hbm [shape: f32[2,8,96], index: 2, kind: output, shape index: {}]  }
   0x1   :  { %9 = vsyncpa [#allocation3 + $0x1], 0 }
   0x2   :  { %10 = vsyncpa [#allocation6], 0 }
   0x3   :  { %11 = vsyncpa [#allocation4], 0 }
   0x4   :  { %13 = vsyncpa [#allocation4 + $0x1], 0  ;;  %s662_s9 = smov 0   ;;  %s664_s10 = smov 0  }
   0x5   :  { %s666_s11 = smov 0   ;;  %s668_s12 = smov 0  }
   0x6   :  { %s670_s13 = smov 0   ;;  %s672_s14 = smov 0  }
   0x7 LB: > { %s377_s15 = sadd.s32 4294967295, %s637_s14   ;;  %s378_s16 = sadd.s32 4294967294, %s637_s14   ;;  %s637_s14 = sphi %s672_s14, %s19_s14   ;;  %s633_s13 = sphi %s670_s13, %s902_s13   ;;  %s629_s12 = sphi %s668_s12, %s901_s12   ;;  %s625_s11 = sphi %s666_s11, %s900_s11   ;;  %s621_s10 = sphi %s664_s10, %s899_s10   ;;  %s617_s9 = sphi %s662_s9, %s898_s9  }
   0x8   : > { %p53_p0 = scmp.ne.s32.totalorder %s621_s10, %s617_s9  ;;  %p696_p1 = scmp.eq.s32.totalorder %s377_s15, 0 }
   0x9   : > { %p700_p2 = scmp.eq.s32.totalorder %s377_s15, 1  ;;  %p106_p3 = scmp.eq.s32.totalorder %s378_s16, 1 }
   0xa   : > { %s883_s17 = scalar_select %p696_p1, 1, 0 }
   0xb   : > { %s884_s18 = scalar_select %p700_p2, 1, 0 }
   0xc   : > { %p706_p4 = por %p696_p1, %p53_p0  ;;  %p379_p5 = scmp.ge.s32.totalorder %s637_s14, 1 }
   0xd   : > { %p711_p6 = por %p106_p3, %p53_p0  ;;  %p113_p7 = scmp.lt.s32.totalorder %s637_s14, 3 }
   0xe   : > { %s885_s19 = scalar_select %p706_p4, 1, 0 }
   0xf   : > { %s886_s20 = scalar_select %p711_p6, 1, 0 }
  0x10   : > { %p716_p8 = pnand %p379_p5, %p113_p7  ;;  %s639_s22 = smov [#allocation5]  }
  0x11   : > { %s125_s23 = sshll.u32 %s639_s22, 4  ;;  %s31_s25 = sadd.s32 1, %s633_s13  ;;  %s126_s23 = int_to_ptr.vmem [resolvable:$true] %s125_s23 }
  0x12   : > { %s887_s21 = scalar_select %p716_p8, 1, 0 }
  0x13   : > { %p423_p9 = pneg %p716_p8  ;;  %s493_s28 = scalar_lea.hbm %s877_s1, 512 }
  0x14   : > { %p494_p12 = scmp.ne.s32.totalorder %s877_s1, %s493_s28  ;;  %p500_p5 = scmp.lt.u32.totalorder %s493_s28, %s877_s1 }
  0x15   : > { %p725_p11 = pnand %p423_p9, %p696_p1 }
  0x17   : > { %p495_p13 = pneg %p725_p11 }
  0x19   : > { %p496_p0 = pnand %p495_p13, %p494_p12 }
  0x1b   : > { %p497_p3 = pneg %p496_p0 }
  0x1d   : > { %p502_p7 = pnand %p500_p5, %p497_p3 }
  0x1f   : > { %505 = shalt.err (!%p502_p7)
}
  0x20   : > { %s506_s5 = scalar_lea.vmem %s126_s23, 512  ;;  %p514_p1 = scmp.lt.s32.totalorder %s126_s23, %s126_s23 }
  0x21   : > { %p507_p9 = scmp.ne.s32.totalorder %s126_s23, %s506_s5  ;;  %p515_p4 = scmp.lt.s32.totalorder %s506_s5, %s506_s5 }
  0x23   : > { %p509_p10 = pnand %p507_p9, %p495_p13  ;;  %p516_p8 = por %p515_p4, %p514_p1 }
  0x25   : > { %p510_p6 = pneg %p509_p10 }
  0x27   : > { %p517_p2 = pnand %p516_p8, %p510_p6 }
  0x29   : > { %520 = shalt.err (!%p517_p2)
}
  0x2a   : > { %s640_s6 = smov 128   ;;  %s641_s7 = smov 8  }
  0x2b   : > { %426 = dma.hbm_to_vmem [thread:$0]  (!%p725_p11), %s877_s1, 512, %s126_s23, [#allocation6], %s640_s6, %s640_s6, %s641_s7  }
  0x2c   : > { %p33_p1 = scmp.ge.s32.totalorder %s31_s25, 2  ;;  %s40_s16 = sadd.s32 1, %s625_s11 }
  0x2d   : > { %p47_p2 = scmp.ne.s32.totalorder %s625_s11, %s621_s10  ;;  %p48_p4 = scmp.eq.s32.totalorder %s637_s14, 0 }
  0x2e   : > { %s904_s25 = smov (%p33_p1, %s31_s25), 0  ;;  %p890_p8 = scmp.ne.s32.totalorder %s884_s18, 0 }
  0x2f   : > { %p752_p6 = por %p48_p4, %p47_p2  ;;  %s35_s24 = ssub.s32 %s633_s13, %s904_s25 }
  0x30   : > { %p758_p10 = por %p890_p8, %p47_p2  ;;  %p436_p12 = scmp.lt.s32.totalorder %s637_s14, 2 }
  0x31   : > { %p38_p11 = scmp.eq.s32.totalorder %s35_s24, 0  ;;  %s139_s23 = sand.u32 1, %s625_s11  }
  0x32   : > { %s382_s27 = sshll.u32 %s139_s23, 3  ;;  %s383_s29 = sshll.u32 %s633_s13, 7 }
  0x33   : > { %s767_s28 = scalar_select %p38_p11, %s625_s11, %s40_s16  }
  0x34   : > { %s773_s4 = scalar_lea.hbm %s876_s0, %s383_s29  ;;  %s143_s18 = scalar_lea.vmem [#allocation2], %s382_s27 }
  0x35   : > { %s151_s5 = sshll.u32 %s143_s18, 4  ;;  %p779_p13 = pnand %p436_p12, %p752_p6  ;;  %s775_s5 = int_to_ptr.vmem [resolvable:$true] %s151_s5 }
  0x36   : > { %s140_s7 = scalar_lea.sflag [#allocation3], %s139_s23  ;;  %s521_s8 = scalar_lea.hbm %s773_s4, 128 }
  0x37   : > { %p522_p0 = scmp.ne.s32.totalorder %s773_s4, %s521_s8  ;;  %p523_p3 = pneg %p779_p13 }
  0x38   : > { %s526_s24 = scalar_lea.hbm %s876_s0, 256  ;;  %p527_p9 = scmp.lt.u32.totalorder %s773_s4, %s876_s0 }
  0x39   : > { %p524_p5 = pnand %p523_p3, %p522_p0  ;;  %p528_p1 = scmp.lt.u32.totalorder %s526_s24, %s521_s8 }
  0x3a   : > { %p530_p4 = scmp.lt.u32.totalorder %s521_s8, %s773_s4 }
  0x3b   : > { %p525_p7 = pneg %p524_p5  ;;  %p529_p2 = por %p528_p1, %p527_p9 }
  0x3d   : > { %p531_p6 = por %p530_p4, %p529_p2 }
  0x3f   : > { %p532_p8 = pnand %p531_p6, %p525_p7 }
  0x41   : > { %535 = shalt.err (!%p532_p8)
}
  0x42   : > { %s536_s23 = scalar_lea.vmem %s775_s5, 128  ;;  %s642_s29 = smov [#allocation2]  }
  0x43   : > { %p537_p12 = scmp.ne.s32.totalorder %s775_s5, %s536_s23  ;;  %s541_s30 = sshll.u32 %s642_s29, 4  ;;  %s542_s30 = int_to_ptr.vmem [resolvable:$false] %s541_s30 }
  0x44   : > { %s543_s3 = scalar_lea.vmem %s542_s30, 256  ;;  %p544_p5 = scmp.lt.s32.totalorder %s775_s5, %s542_s30 }
  0x45   : > { %p539_p11 = pnand %p537_p12, %p523_p3  ;;  %p545_p9 = scmp.lt.s32.totalorder %s543_s3, %s536_s23 }
  0x47   : > { %p540_p0 = pneg %p539_p11  ;;  %p546_p1 = por %p545_p9, %p544_p5 }
  0x49   : > { %p547_p2 = pnand %p546_p1, %p540_p0 }
  0x4b   : > { %550 = shalt.err (!%p547_p2)
}
  0x4c   : > { %430 = dma.hbm_to_vmem [thread:$0]  (!%p779_p13), %s773_s4, 128, %s775_s5, %s140_s7  }
  0x4d   : > { %p893_p7 = scmp.ne.s32.totalorder %s887_s21, 0 }
  0x4e   : > { %s811_s18 = sand.u32 (!%p893_p7), 1, %s621_s10   ;;  %p894_p3 = scmp.ne.s32.totalorder (!%p893_p7), %s885_s19, 0 }
  0x4f   : > { %160 = sbr.rel (%p893_p7) target bundleno = 327 (0x147), region = 28  ;;  %s385_s8 = sshll.u32 (!%p893_p7), %s811_s18, 3 }
  0x50   : > { %s163_s15 = scalar_lea.sflag (!%p893_p7), [#allocation3], %s811_s18  ;;  %s166_s16 = scalar_lea.vmem (!%p893_p7), [#allocation2], %s385_s8 }
  0x56   : > { %604 = dma.done.wait (%p894_p3), %s163_s15, 128  }
  0x57   : > { %606 = vsyncadd (%p894_p3), %s163_s15, 4294967168  ;;  %p895_p4 = scmp.ne.s32.totalorder %s883_s17, 0 }
  0x59   : > { %608 = dma.done.wait (%p895_p4), [#allocation6], 512  }
  0x5a   : > { %610 = vsyncadd (%p895_p4), [#allocation6], 4294966784  ;;  %v643_v0 = vmov 0.0|0.0   ;;  %vm644_vm0 = vmmov 0   ;;  %v645_v1 = vmov 0.0   ;;  %v192_v2 = vld [vmem:[#allocation5] sm:$0xff] }
  0x5b   : > { %409 = vmatprep.subr.bf16.mxu0 %v643_v0  ;;  %406 = vmatprep.mubr.msk.f32.mxu0 %vm644_vm0, %v645_v1  ;;  %v193_v3 = vld [vmem:[#allocation5 + $0x8] sm:$0xff]  ;;  %v194_v4 = vld [vmem:[#allocation5 + $0x10] sm:$0xff]  ;;  %v195_v6 = vld [vmem:[#allocation5 + $0x18] sm:$0xff]  ;;  %vm196_vm1 = vcmask 261120   ;;  %s390_s17 = sshll.u32 %s629_s12, 7  ;;  %s190_s19 = scalar_lea.vmem [#allocation7], %s385_s8 }
  0x5c   : > { %v410_v5 = vpack.c.bf16 %v193_v3, %v192_v2  ;;  %v413_v7 = vpack.c.bf16 %v195_v6, %v194_v4  ;;  %v191_v8 = vld [vmem:[%s166_s16] sm:$0xff]  ;;  %s287_s21 = sshll.u32 %s190_s19, 4  ;;  %vm270_vm2 = vcmask 785408   ;;  %s827_s6 = scalar_lea.hbm %s878_s2, %s390_s17  ;;  %s829_s21 = int_to_ptr.vmem [resolvable:$true] %s287_s21 }
  0x5d   : > { %s273_s7 = scalar_lea.sflag [#allocation4], %s811_s18  ;;  %s551_s24 = scalar_lea.vmem %s829_s21, 128 }
  0x5e   : > { %411 = vmatpush3.bf16.msra.mxu0 %v410_v5  ;;  %p552_p13 = scmp.ne.s32.totalorder %s829_s21, %s551_s24  ;;  %s646_s12 = smov [#allocation7]  }
  0x5f   : > { %412 = vmatprep.subr.bf16.mxu0 %v643_v0  ;;  %s555_s22 = sshll.u32 %s646_s12, 4  ;;  %s556_s22 = int_to_ptr.vmem [resolvable:$false] %s555_s22 }
  0x60   : > { %p553_p6 = pnand %p552_p13, %p758_p10  ;;  %s557_s27 = scalar_lea.vmem %s556_s22, 256 }
  0x61   : > { %p558_p12 = scmp.lt.s32.totalorder %s829_s21, %s556_s22  ;;  %p559_p11 = scmp.lt.s32.totalorder %s557_s27, %s551_s24 }
  0x62   : > { %414 = vmatpush3.bf16.msra.mxu0 %v413_v7  ;;  %p554_p8 = pneg %p553_p6 }
  0x63   : > { %p560_p0 = por %p559_p11, %p558_p12 }
  0x65   : > { %407 = vmatmul.mubr.msk.f32.vlgmr.msra.gmra.mrb[0].mxu0 %vm196_vm1, %v191_v8  ;;  %p561_p5 = pnand %p560_p0, %p554_p8 }
 0x138   : > { %v266_v9 = vpop.f32.mrb[0].mxu0 }
 0x139   : > { %271 = vst.msk [vmem:[%s190_s19] sm:$0xff] %vm270_vm2, %v266_v9  ;;  %v408_v10 = vpop.f32.mrb[1].mxu0 }
 0x13a   : > { %564 = shalt.err (!%p561_p5)
}
 0x13b   : > { %s565_s23 = scalar_lea.hbm %s827_s6, 128  ;;  %s569_s3 = scalar_lea.hbm %s878_s2, 256 }
 0x13c   : > { %p566_p9 = scmp.ne.s32.totalorder %s827_s6, %s565_s23  ;;  %p570_p7 = scmp.lt.u32.totalorder %s827_s6, %s878_s2 }
 0x13d   : > { %p571_p3 = scmp.lt.u32.totalorder %s569_s3, %s565_s23  ;;  %p573_p13 = scmp.lt.u32.totalorder %s565_s23, %s827_s6 }
 0x13e   : > { %p567_p1 = pnand %p566_p9, %p758_p10 }
 0x13f   : > { %p572_p4 = por %p571_p3, %p570_p7 }
 0x140   : > { %p568_p2 = pneg %p567_p1 }
 0x141   : > { %p574_p6 = por %p573_p13, %p572_p4 }
 0x143   : > { %p575_p8 = pnand %p574_p6, %p568_p2 }
 0x145   : > { %578 = shalt.err (!%p575_p8)
}
 0x146   : > { %421 = dma.vmem_to_hbm [thread:$0]  (%p758_p10), %s829_s21, 128, %s827_s6, %s273_s7  }
 0x147 PF: > { %s299_s15 = sand.u32 1, %s617_s9   ;;  %p896_p12 = scmp.ne.s32.totalorder %s886_s20, 0 }
 0x148   : > { %p897_p11 = scmp.ge.s32.totalorder %s637_s14, 2  ;;  %s300_s16 = scalar_lea.sflag [#allocation4], %s299_s15 }
 0x14a   : > { %p432_p0 = pnand %p897_p11, %p896_p12 }
 0x14c   : > { %612 = dma.done.wait (!%p432_p0), %s300_s16, 128  }
 0x14d   : > { %614 = vsyncadd (!%p432_p0), %s300_s16, 4294967168  ;;  %s19_s14 = sadd.s32 1, %s637_s14   ;;  %s898_s9 = smov %s621_s10 }
 0x14e   : > { %p16_p5 = scmp.ge.s32.totalorder %s19_s14, 4   ;;  %s899_s10 = smov %s625_s11 }
 0x14f   : > { %s900_s11 = smov %s767_s28  ;;  %s901_s12 = smov %s633_s13 }
 0x150   : > { %s902_s13 = smov %s904_s25  ;;  %18 = sbr.rel (!%p16_p5) target bundleno = 7 (0x7), region = 77 }
 0x157   :  { %305 = vsyncpa [#allocation3], 1 }
 0x158   :  { %307 = vsyncpa [#allocation3 + $0x1], 1 }
 0x159   :  { %308 = vsyncpa [#allocation6], 1 }
 0x15a   :  { %309 = vsyncpa [#allocation4], 1 }
 0x15b   :  { %311 = vsyncpa [#allocation4 + $0x1], 1 }

</bundles_post_ra>
